<compile_context>
chip_gen: v6e
topology: v6e:2x2x1
jax: 0.10.0
libtpu: 0.0.40
codegen_flags: <defaults>
</compile_context>

<pallas_src>
import jax
import jax.numpy as jnp
from jax.experimental import pallas as pl
from jax.experimental.pallas import tpu as pltpu

_MIB = 1024 * 1024


def _round_up(v, m):
    return ((v + m - 1) // m) * m


def _round_down(v, m):
    return (v // m) * m


def _cdiv(a, b):
    return (a + b - 1) // b


def _vmem_capacity_bytes():
    """Physical VMEM per TensorCore, with a conservative (v7x-sized) fallback."""
    try:
        return int(pltpu.get_tpu_info().vmem_capacity_bytes)
    except Exception:
        return 64 * _MIB


def _vmem_policy():
    """(tile-sizing budget, scoped-vmem clamp) per TPU generation."""
    cap = _vmem_capacity_bytes()
    if cap >= 96 * _MIB:            # v5e / v6e: 128 MiB physical per core
        limit_cap = 96 * _MIB
        budget = 80 * _MIB
    else:                            # v7x: 64 MiB physical per core (or unknown)
        limit_cap = max(min(48 * _MIB, cap - 16 * _MIB), 24 * _MIB)
        budget = int(cap * 0.55)
    budget = min(budget, limit_cap - 6 * _MIB)
    return budget, limit_cap


def _pick_tiling(rows, emb, x_bytes, budget_bytes):
    """Choose (tile_rows, slab_rows, num_slabs, emb_padded_for_accounting)."""
    emb_p = _round_up(emb, 128)                    # physical lane-padded width
    sublane = max(8, 32 // max(x_bytes, 1))        # 8 f32 / 16 bf16 / 32 int8

    # Compute slab: bounds each live f32 intermediate to ~1 MiB.
    slab_target = _round_down(_MIB // (emb_p * 4), sublane)
    slab_target = max(sublane, min(512, slab_target))

    # DMA footprint per row: double-buffered input + double-buffered output.
    per_row_dma = 4 * emb_p * x_bytes
    interm = 6 * slab_target * emb_p * 4           # f32 slab intermediates
    avail = max(budget_bytes - interm - 2 * _MIB, per_row_dma * sublane)
    tile = avail // per_row_dma

    # Keep >= ~8 grid steps when rows permit (v7x 2-TC sharding + pipeline
    # overlap), but never shrink a block below a ~2 MiB input-DMA floor.
    occupancy_rows = _cdiv(rows, 8)
    floor_rows = _cdiv(2 * _MIB, emb_p * x_bytes)
    if tile > occupancy_rows:
        tile = max(occupancy_rows, floor_rows)
    tile = min(tile, avail // per_row_dma)         # stay inside the budget
    tile = min(tile, _round_up(rows, sublane))     # don't exceed the input
    tile = max(_round_down(tile, sublane), sublane)

    if tile <= slab_target:
        slab = tile
    else:
        slab = slab_target
        tile = _round_down(tile, slab)
    num_slabs = tile // slab
    return tile, slab, num_slabs, emb_p


def _make_layernorm_kernel(emb, eps, slab_rows, num_slabs):
    inv_emb = 1.0 / float(emb)      # constant multiply instead of VPU divide

    def kernel(x_ref, scale_ref, shift_ref, o_ref):
        # x_ref/o_ref: (TILE_ROWS, EMB); scale_ref/shift_ref: (1, EMB).
        # Hoisted broadcasts (JAX does not CSE broadcast_in_dim inside loops).
        scale = jnp.broadcast_to(scale_ref[...].astype(jnp.float32),
                                 (slab_rows, emb))
        shift = jnp.broadcast_to(shift_ref[...].astype(jnp.float32),
                                 (slab_rows, emb))

        def slab_body(r0):
            x = x_ref[pl.ds(r0, slab_rows), :].astype(jnp.float32)
            # Reductions run over the true feature width (there are no padded
            # lanes in the logical block), matching torch mean / var(unbiased=False).
            mean = jnp.sum(x, axis=-1, keepdims=True) * inv_emb
            centered = x - mean
            var = jnp.sum(centered * centered, axis=-1, keepdims=True) * inv_emb
            inv_std = jax.lax.rsqrt(var + eps)      # EUP slot, effectively free
            o_ref[pl.ds(r0, slab_rows), :] = (
                scale * (centered * inv_std) + shift).astype(o_ref.dtype)

        if num_slabs == 1:
            slab_body(0)
        else:
            def loop_body(s, carry):
                slab_body(pl.multiple_of(s * slab_rows, slab_rows))
                return carry
            jax.lax.fori_loop(0, num_slabs, loop_body, 0)

    return kernel


def layernorm(x, scale, shift, *, eps=1e-5, tile_rows=None):
    """x: (rows, emb); scale, shift: (emb,). Normalizes each row over emb."""
    rows, emb = x.shape
    x_bytes = jnp.dtype(x.dtype).itemsize
    budget, limit_cap = _vmem_policy()

    tile, slab, num_slabs, emb_p = _pick_tiling(rows, emb, x_bytes, budget)
    if tile_rows is not None:
        tile = int(tile_rows)
        slab = min(slab, tile)
        tile = max(_round_down(tile, slab), slab)
        num_slabs = tile // slab

    # TODO(synk): for production shapes with emb << 128, pack 128//emb logical
    # rows per lane-row and do a segmented lane reduction instead of leaving
    # (128 - emb) lanes idle in this bandwidth-bound kernel.

    # scale/shift presented as (1, emb) so they broadcast across the row tile.
    scale2d = scale.reshape(1, emb)
    shift2d = shift.reshape(1, emb)

    # Scoped-VMEM estimate for this tiling (double-buffered in/out + f32 slabs).
    usage = (4 * tile * emb_p * x_bytes            # x + out, 2 buffers each
             + 6 * slab * emb_p * 4                # f32 slab intermediates
             + 8 * emb_p * 4                       # scale/shift buffers
             + 2 * _MIB)                           # slack
    vmem_limit = int(min(max(usage, 16 * _MIB), limit_cap))

    kernel = _make_layernorm_kernel(emb, eps, slab, num_slabs)
    grid = (_cdiv(rows, tile),)     # Pallas clips the ragged last row block

    return pl.pallas_call(
        kernel,
        out_shape=jax.ShapeDtypeStruct((rows, emb), x.dtype),
        grid_spec=pltpu.PrefetchScalarGridSpec(
            num_scalar_prefetch=0,
            grid=grid,
            in_specs=[
                pl.BlockSpec((tile, emb), lambda i: (i, 0)),
                pl.BlockSpec((1, emb), lambda i: (0, 0)),
                pl.BlockSpec((1, emb), lambda i: (0, 0)),
            ],
            out_specs=pl.BlockSpec((tile, emb), lambda i: (i, 0)),
        ),
        compiler_params=pltpu.CompilerParams(
            dimension_semantics=("parallel",),
            vmem_limit_bytes=vmem_limit,
        ),
    )(x, scale2d, shift2d)


def layernorm_nd(x, scale, shift, **kw):
    """Applies layernorm over the last dim of an arbitrarily-shaped input."""
    lead = x.shape[:-1]
    emb = x.shape[-1]
    out2d = layernorm(x.reshape(-1, emb), scale, shift, **kw)
    return out2d.reshape(*lead, emb)


if __name__ == "__main__":
    key = jax.random.PRNGKey(0)
    batch, seq, emb_dim = 2, 8, 32

    # Deterministic parameter init, matching nn.Parameter(torch.ones/zeros(emb_dim)).
    scale = jnp.ones((emb_dim,), dtype=jnp.float32)
    shift = jnp.zeros((emb_dim,), dtype=jnp.float32)

    x = jax.random.normal(key, (batch, seq, emb_dim), dtype=jnp.float32)

    out = layernorm_nd(x, scale, shift)
    jax.block_until_ready(out)

    # Reference check in plain JAX (same math as the PyTorch module).
    mean = jnp.mean(x, axis=-1, keepdims=True)
    var = jnp.mean((x - mean) ** 2, axis=-1, keepdims=True)
    ref = scale * ((x - mean) / jnp.sqrt(var + 1e-5)) + shift
    assert jnp.allclose(out, ref, atol=1e-5, rtol=1e-5), "mismatch vs reference"

    print("KERNEL_OK")
</pallas_src>

<mosaic_0001>
module attributes {stable_mosaic.version = 11 : i64} {
  func.func @kernel(%arg0: i32, %arg1: memref<16x32xf32, #tpu.memory_space<vmem>>, %arg2: memref<1x32xf32, #tpu.memory_space<vmem>>, %arg3: memref<1x32xf32, #tpu.memory_space<vmem>>, %arg4: memref<16x32xf32, #tpu.memory_space<vmem>>) attributes {dimension_semantics = [#tpu.dimension_semantics<parallel>], iteration_bounds = array<i64: 1>, scalar_prefetch = 0 : i64, scratch_operands = 0 : i64, tpu.core_type = #tpu.core_type<tc>, window_params = [{transform_indices = @transform_0, window_bounds = array<i64: 16, 32>}, {pipeline_mode = #tpu.pipeline_mode<synchronous>, transform_indices = @transform_1, window_bounds = array<i64: 1, 32>}, {pipeline_mode = #tpu.pipeline_mode<synchronous>, transform_indices = @transform_2, window_bounds = array<i64: 1, 32>}, {transform_indices = @transform_3, window_bounds = array<i64: 16, 32>}]} {
    %c0 = arith.constant 0 : index
    %c0_0 = arith.constant 0 : index
    %0 = vector.load %arg2[%c0, %c0_0] : memref<1x32xf32, #tpu.memory_space<vmem>>, vector<1x32xf32>
    %1 = vector.shape_cast %0 : vector<1x32xf32> to vector<1x32xf32>
    %2 = vector.broadcast %1 : vector<1x32xf32> to vector<16x32xf32>
    %c0_1 = arith.constant 0 : index
    %c0_2 = arith.constant 0 : index
    %3 = vector.load %arg3[%c0_1, %c0_2] : memref<1x32xf32, #tpu.memory_space<vmem>>, vector<1x32xf32>
    %4 = vector.shape_cast %3 : vector<1x32xf32> to vector<1x32xf32>
    %5 = vector.broadcast %4 : vector<1x32xf32> to vector<16x32xf32>
    %c0_3 = arith.constant 0 : index
    %c0_4 = arith.constant 0 : index
    %6 = vector.load %arg1[%c0_3, %c0_4] : memref<16x32xf32, #tpu.memory_space<vmem>>, vector<16x32xf32>
    %cst = arith.constant dense<0.000000e+00> : vector<16xf32>
    %7 = vector.multi_reduction <add>, %6, %cst [1] : vector<16x32xf32> to vector<16xf32>
    %8 = vector.shape_cast %7 : vector<16xf32> to vector<16x1xf32>
    %cst_5 = arith.constant 3.125000e-02 : f32
    %9 = vector.broadcast %cst_5 : f32 to vector<16x1xf32>
    %10 = arith.mulf %8, %9 : vector<16x1xf32>
    %11 = vector.broadcast %10 : vector<16x1xf32> to vector<16x32xf32>
    %12 = arith.subf %6, %11 : vector<16x32xf32>
    %13 = arith.mulf %12, %12 : vector<16x32xf32>
    %cst_6 = arith.constant dense<0.000000e+00> : vector<16xf32>
    %14 = vector.multi_reduction <add>, %13, %cst_6 [1] : vector<16x32xf32> to vector<16xf32>
    %15 = vector.shape_cast %14 : vector<16xf32> to vector<16x1xf32>
    %cst_7 = arith.constant 3.125000e-02 : f32
    %16 = vector.broadcast %cst_7 : f32 to vector<16x1xf32>
    %17 = arith.mulf %15, %16 : vector<16x1xf32>
    %cst_8 = arith.constant 9.99999974E-6 : f32
    %18 = vector.broadcast %cst_8 : f32 to vector<16x1xf32>
    %19 = arith.addf %17, %18 : vector<16x1xf32>
    %20 = math.rsqrt %19 : vector<16x1xf32>
    %21 = vector.broadcast %20 : vector<16x1xf32> to vector<16x32xf32>
    %22 = arith.mulf %12, %21 : vector<16x32xf32>
    %23 = arith.mulf %2, %22 : vector<16x32xf32>
    %24 = arith.addf %23, %5 : vector<16x32xf32>
    %c0_9 = arith.constant 0 : index
    %c0_10 = arith.constant 0 : index
    %25 = vector.load %arg4[%c0_9, %c0_10] : memref<16x32xf32, #tpu.memory_space<vmem>>, vector<16x32xf32>
    tpu.vector_store %arg4[%c0_9, %c0_10], %24 {strides = array<i32>} : memref<16x32xf32, #tpu.memory_space<vmem>>, vector<16x32xf32>,
    return
  }
  func.func @transform_0(%arg0: i32) -> (i32, i32) {
    %c0_i32 = arith.constant 0 : i32
    %c0_i32_0 = arith.constant 0 : i32
    return %arg0, %c0_i32 : i32, i32
  }
  func.func @transform_1(%arg0: i32) -> (i32, i32) {
    %c0_i32 = arith.constant 0 : i32
    %c0_i32_0 = arith.constant 0 : i32
    %c0_i32_1 = arith.constant 0 : i32
    return %c0_i32, %c0_i32_0 : i32, i32
  }
  func.func @transform_2(%arg0: i32) -> (i32, i32) {
    %c0_i32 = arith.constant 0 : i32
    %c0_i32_0 = arith.constant 0 : i32
    %c0_i32_1 = arith.constant 0 : i32
    return %c0_i32, %c0_i32_0 : i32, i32
  }
  func.func @transform_3(%arg0: i32) -> (i32, i32) {
    %c0_i32 = arith.constant 0 : i32
    %c0_i32_0 = arith.constant 0 : i32
    return %arg0, %c0_i32 : i32, i32
  }
}

</mosaic_0001>

<bundles_post_ra>
// kernel: tpu_custom_call.1
= control target key start
LH: loop header
LB: loop body
LE: loop exit
PB: predicated region body
PF: predicated region fallthrough
CT: control target
= control target key end

     0   :  { %8 = vsyncpa [#allocation3], 0  ;;  %s197_s0 = inlined_call_operand.hbm [shape: f32[16,32], index: 0, kind: input, shape index: {}]   ;;  %s198_s1 = inlined_call_operand.vmem [shape: f32[1,32], index: 1, kind: input, shape index: {}]   ;;  %s199_s2 = inlined_call_operand.vmem [shape: f32[1,32], index: 2, kind: input, shape index: {}]   ;;  %s200_s3 = inlined_call_operand.hbm [shape: f32[16,32], index: 3, kind: output, shape index: {}]  }
   0x1   :  { %9 = vsyncpa [#allocation4], 0  ;;  %s149_s12 = smov [#allocation2]  }
   0x2   :  { %s15_s13 = sshll.u32 %s149_s12, 4  ;;  %s16_s13 = int_to_ptr.vmem [resolvable:$true] %s15_s13 }
   0x3   :  { %s113_s14 = scalar_lea.vmem %s16_s13, 256  ;;  %p118_p1 = scmp.lt.s32.totalorder %s16_s13, %s16_s13 }
   0x4   :  { %p114_p0 = scmp.ne.s32.totalorder %s16_s13, %s113_s14  ;;  %p119_p2 = scmp.lt.s32.totalorder %s113_s14, %s113_s14 }
   0x6   :  { %p120_p3 = por %p119_p2, %p118_p1 }
   0x8   :  { %p121_p4 = pnand %p120_p3, %p114_p0 }
   0xa   :  { %124 = shalt.err (!%p121_p4)
}
   0xb   :  { %s150_s15 = smov 128   ;;  %s151_s16 = smov 8  }
   0xc   :  { %21 = dma.hbm_to_vmem [thread:$0]  %s197_s0, 256, %s16_s13, [#allocation3], %s150_s15, %s150_s15, %s151_s16  }
   0xd   :  { %145 = dma.done.wait [#allocation3], 256  }
   0xe   :  { %146 = vsyncadd [#allocation3], 4294967040  ;;  %vm45_vm0 = vcmask 261120   ;;  %v43_v0 = vld [vmem:[#allocation2] sm:$0xff]  ;;  %v44_v1 = vld [vmem:[#allocation2 + $0x8] sm:$0xff]  ;;  %s152_s22 = smov [#allocation5]  }
   0xf   :  { %v46_v2 = vsel %vm45_vm0, %v43_v0, 0.0  ;;  %v49_v3 = vsel %vm45_vm0, %v44_v1, 0.0  ;;  %v95_v21 = vld [vmem:[%s198_s1] ss:$0 sm:$0xff]  ;;  %s83_s23 = sshll.u32 %s152_s22, 4  ;;  %s84_s23 = int_to_ptr.vmem [resolvable:$true] %s83_s23 }
  0x10   :  { %47 = vadd.xlane.f32.xlu0 %v46_v2  ;;  %v96_v23 = vld [vmem:[%s199_s2] ss:$0 sm:$0xff]  ;;  %s125_s24 = scalar_lea.vmem %s84_s23, 256  ;;  %p130_p6 = scmp.lt.s32.totalorder %s84_s23, %s84_s23 }
  0x11   :  { %p126_p5 = scmp.ne.s32.totalorder %s84_s23, %s125_s24  ;;  %p131_p7 = scmp.lt.s32.totalorder %s125_s24, %s125_s24 }
  0x13   :  { %p132_p8 = por %p131_p7, %p130_p6 }
  0x14   :  { %50 = vadd.xlane.f32.xlu0 %v49_v3 }
  0x15   :  { %p133_p9 = pnand %p132_p8, %p126_p5 }
  0x99   :  { %v48_v4 = vpop.xlane.xlu0 %47 }
  0x9a   :  { %v52_v5 = vmul.f32 0.03125, %v48_v4 }
  0x9c   :  { %v54_v6 = vsub.f32 %v43_v0, %v52_v5 }
  0x9d   :  { %v51_v7 = vpop.xlane.xlu0 %50 }
  0x9e   :  { %v53_v8 = vmul.f32 0.03125, %v51_v7  ;;  %v56_v9 = vmul.f32 %v54_v6, %v54_v6 }
  0xa0   :  { %v55_v10 = vsub.f32 %v44_v1, %v53_v8  ;;  %v58_v11 = vsel %vm45_vm0, %v56_v9, 0.0 }
  0xa1   :  { %59 = vadd.xlane.f32.xlu1 %v58_v11 }
  0xa2   :  { %v57_v12 = vmul.f32 %v55_v10, %v55_v10 }
  0xa4   :  { %v61_v13 = vsel %vm45_vm0, %v57_v12, 0.0 }
  0xa5   :  { %62 = vadd.xlane.f32.xlu1 %v61_v13 }
 0x12a   :  { %v60_v14 = vpop.xlane.xlu1 %59 }
 0x12b   :  { %v64_v15 = vmul.f32 0.03125, %v60_v14 }
 0x12d   :  { %v66_v16 = vadd.f32 1e-05, %v64_v15 }
 0x12e   :  { %v63_v17 = vpop.xlane.xlu1 %62 }
 0x12f   :  { %101 = vrsqrt.f32 %v66_v16  ;;  %v65_v18 = vmul.f32 0.03125, %v63_v17 }
 0x131   :  { %v67_v19 = vadd.f32 1e-05, %v65_v18 }
 0x133   :  { %103 = vrsqrt.f32 %v67_v19 }
 0x13c   :  { %v102_v20 = vpop.eup %101 }
 0x13d   :  { %v70_v22 = vmul.f32 %v102_v20, %v54_v6 }
 0x13f   :  { %v72_v24 = vmul.f32 %v95_v21, %v70_v22 }
 0x140   :  { %v104_v25 = vpop.eup %103 }
 0x141   :  { %v71_v26 = vmul.f32 %v104_v25, %v55_v10  ;;  %v74_v27 = vadd.f32 %v96_v23, %v72_v24 }
 0x143   :  { %v73_v28 = vmul.f32 %v95_v21, %v71_v26  ;;  %76 = vst.msk [vmem:[#allocation5] sm:$0xff] %vm45_vm0, %v74_v27 }
 0x145   :  { %v75_v29 = vadd.f32 %v96_v23, %v73_v28 }
 0x147   :  { %77 = vst.msk [vmem:[#allocation5 + $0x8] sm:$0xff] %vm45_vm0, %v75_v29 }
 0x148   :  { %136 = shalt.err (!%p133_p9)
}
 0x149   :  { %89 = dma.vmem_to_hbm [thread:$0]  %s84_s23, 256, %s200_s3, [#allocation4], %s150_s15, %s150_s15, %s151_s16  }
 0x14a   :  { %147 = dma.done.wait [#allocation4], 256  }
 0x14b   :  { %148 = vsyncadd [#allocation4], 4294967040 }
 0x14c   :  { %93 = vsyncpa [#allocation3], 1 }
 0x14d   :  { %94 = vsyncpa [#allocation4], 1 }

</bundles_post_ra>
